<compile_context>
chip_gen: v7x
topology: tpu7x:2x2x1
jax: 0.10.0
libtpu: 0.0.40
codegen_flags: <defaults>
</compile_context>

<pallas_src>
import jax
import jax.numpy as jnp
from jax.experimental import pallas as pl
from jax.experimental.pallas import tpu as pltpu


_VMEM = pl.BlockSpec(memory_space=pltpu.MemorySpace.VMEM)
_LANES = 128


def _round_up(x, m):
    return ((x + m - 1) // m) * m


# ------------------------------ fused kernel ------------------------------ #

def make_decoder_kernel(num_layers, hidden_pad):
    """Fused kernel: embedding gather + `num_layers` GRU cells + FC projection.

    Ref order:
      tok (B,1) i32 | emb (V,E) | h0 (L,B,Hp) |
      per layer l: wx_all (in_p, 3Hp), wh_all (Hp, 3Hp),
                   bx_all (1, 3Hp), bh_n (1, Hp)            (4 refs / layer)
      fc_w (Hp, O_pad) | fc_b (1, O_pad) |
      outputs: logits (B, O_pad) | h_out (L, B, Hp)
    """
    Hp = hidden_pad
    n_w = 4 * num_layers

    def kernel(*refs):
        tok_ref, emb_ref, h0_ref = refs[0], refs[1], refs[2]
        w_refs = refs[3:3 + n_w]
        fc_w_ref = refs[3 + n_w]
        fc_b_ref = refs[4 + n_w]
        logits_ref = refs[5 + n_w]
        hout_ref = refs[6 + n_w]

        # Embedding lookup as a one-hot matmul (MXU-friendly, no dynamic gather).
        # padding_idx=0: row 0 of the table is zero, so token 0 -> zero vector.
        tok = tok_ref[...]                                    # (B, 1) int32
        B = tok.shape[0]
        V = emb_ref.shape[0]
        onehot = (jax.lax.broadcasted_iota(jnp.int32, (B, V), 1) == tok
                  ).astype(jnp.float32)                       # (B, V)
        x = jnp.dot(onehot, emb_ref[...],
                    preferred_element_type=jnp.float32)       # (B, E)

        # Stacked GRU cells, statically unrolled (seq_len == 1).
        # Gate columns are laid out at 128-aligned offsets [r | z | n], so the
        # slices below are vreg-tile-aligned (no cross-lane shuffles).
        for l in range(num_layers):
            wx_all, wh_all, bx_all, bh_n = w_refs[4 * l:4 * (l + 1)]
            h = h0_ref[l]                                     # (B, Hp)
            gi = (jnp.dot(x, wx_all[...], preferred_element_type=jnp.float32)
                  + bx_all[...])                              # (B, 3Hp)
            gh = jnp.dot(h, wh_all[...],
                         preferred_element_type=jnp.float32)  # (B, 3Hp)
            r = jax.nn.sigmoid(gi[:, 0:Hp] + gh[:, 0:Hp])
            z = jax.nn.sigmoid(gi[:, Hp:2 * Hp] + gh[:, Hp:2 * Hp])
            n = jnp.tanh(gi[:, 2 * Hp:3 * Hp]
                         + r * (gh[:, 2 * Hp:3 * Hp] + bh_n[...]))
            h_new = (1.0 - z) * n + z * h
            hout_ref[l] = h_new                               # lane-dense store
            x = h_new                                         # feeds layer l+1

        # Final projection; padded output width -> lane-dense store.
        logits_ref[...] = (
            jnp.dot(x, fc_w_ref[...], preferred_element_type=jnp.float32)
            + fc_b_ref[...])

    return kernel


# ------------------------------ params ------------------------------------ #

def init_decoder_params(key, output_size, embed_size, hidden_size, num_layers):
    """Deterministic parameter init mirroring the nn.Module __init__ shapes
    (PyTorch layouts: weight = (out_features, in_features), gate order r,z,n)."""
    keys = jax.random.split(key, 3 + 4 * num_layers)
    emb = 0.1 * jax.random.normal(keys[0], (output_size, embed_size), jnp.float32)
    emb = emb.at[0].set(0.0)  # padding_idx=0

    w_ih, w_hh, b_ih, b_hh = [], [], [], []
    for l in range(num_layers):
        in_dim = embed_size if l == 0 else hidden_size
        k0, k1, k2, k3 = jax.random.split(keys[3 + l], 4)
        w_ih.append(0.1 * jax.random.normal(k0, (3 * hidden_size, in_dim), jnp.float32))
        w_hh.append(0.1 * jax.random.normal(k1, (3 * hidden_size, hidden_size), jnp.float32))
        b_ih.append(0.1 * jax.random.normal(k2, (3 * hidden_size,), jnp.float32))
        b_hh.append(0.1 * jax.random.normal(k3, (3 * hidden_size,), jnp.float32))

    fc_w = 0.1 * jax.random.normal(keys[1], (output_size, hidden_size), jnp.float32)
    fc_b = 0.1 * jax.random.normal(keys[2], (output_size,), jnp.float32)

    return {"embedding": emb, "w_ih": w_ih, "w_hh": w_hh, "b_ih": b_ih, "b_hh": b_hh,
            "fc_w": fc_w, "fc_b": fc_b}


def prepare_decoder_kernel_params(params, output_size):
    """One-time re-layout of the PyTorch-layout params for the fused kernel:
    pre-transpose to [K,N], place gates at 128-aligned lane offsets, pre-sum
    the r/z biases, zero-pad hidden width to Hp and FC width to o_pad."""
    H = params["fc_w"].shape[1]
    Hp = _round_up(H, _LANES)
    o_pad = _round_up(output_size, _LANES)

    layers = []
    for l, (w_ih, w_hh, b_ih, b_hh) in enumerate(
            zip(params["w_ih"], params["w_hh"], params["b_ih"], params["b_hh"])):
        in_dim = w_ih.shape[1]                 # E for layer 0, H otherwise
        in_p = in_dim if l == 0 else Hp
        wx = jnp.transpose(w_ih)               # (in_dim, 3H), gate order r,z,n
        wh = jnp.transpose(w_hh)               # (H, 3H)

        wx_all = jnp.zeros((in_p, 3 * Hp), jnp.float32)
        wh_all = jnp.zeros((Hp, 3 * Hp), jnp.float32)
        bx_all = jnp.zeros((1, 3 * Hp), jnp.float32)
        bh_n = jnp.zeros((1, Hp), jnp.float32)
        for g in range(3):
            wx_all = wx_all.at[:in_dim, g * Hp:g * Hp + H].set(wx[:, g * H:(g + 1) * H])
            wh_all = wh_all.at[:H, g * Hp:g * Hp + H].set(wh[:, g * H:(g + 1) * H])
        bx_all = bx_all.at[0, 0:H].set(b_ih[0:H] + b_hh[0:H])                 # b_r
        bx_all = bx_all.at[0, Hp:Hp + H].set(b_ih[H:2 * H] + b_hh[H:2 * H])   # b_z
        bx_all = bx_all.at[0, 2 * Hp:2 * Hp + H].set(b_ih[2 * H:3 * H])       # b_in
        bh_n = bh_n.at[0, 0:H].set(b_hh[2 * H:3 * H])                         # b_hn
        layers.append((wx_all, wh_all, bx_all, bh_n))

    fc_w = jnp.zeros((Hp, o_pad), jnp.float32).at[:H, :output_size].set(
        jnp.transpose(params["fc_w"]))
    fc_b = jnp.zeros((1, o_pad), jnp.float32).at[0, :output_size].set(params["fc_b"])

    return {"embedding": params["embedding"], "layers": layers,
            "fc_w": fc_w, "fc_b": fc_b,
            "output_size": output_size, "o_pad": o_pad,
            "hidden_size": H, "h_pad": Hp}


# ------------------------------ forward ------------------------------------ #

def decoder_forward(kparams, input_token, hidden):
    """input_token: (B,) int32.  hidden: (num_layers, B, H) float32 (GRU).
    Returns (logits (B, output_size), new_hidden (num_layers, B, H))."""
    num_layers, B, H = hidden.shape
    Hp = kparams["h_pad"]
    o_pad = kparams["o_pad"]

    hidden_p = hidden if Hp == H else jnp.pad(
        hidden, ((0, 0), (0, 0), (0, Hp - H)))

    flat_w = [a for layer in kparams["layers"] for a in layer]
    n_inputs = 3 + len(flat_w) + 2

    logits_pad, hidden_out = pl.pallas_call(
        make_decoder_kernel(num_layers, Hp),
        out_shape=(jax.ShapeDtypeStruct((B, o_pad), jnp.float32),
                   jax.ShapeDtypeStruct((num_layers, B, Hp), jnp.float32)),
        in_specs=[_VMEM] * n_inputs,
        out_specs=(_VMEM, _VMEM),
    )(input_token.reshape(B, 1).astype(jnp.int32),
      kparams["embedding"], hidden_p, *flat_w,
      kparams["fc_w"], kparams["fc_b"])

    logits = logits_pad[:, :kparams["output_size"]]
    new_hidden = hidden_out if Hp == H else hidden_out[:, :, :H]
    return logits, new_hidden


# pure-JAX reference (PyTorch-layout math, no Pallas) for a correctness check
def decoder_forward_ref(params, input_token, hidden):
    num_layers = hidden.shape[0]
    x = jnp.take(params["embedding"], input_token, axis=0)
    new_hidden = []
    for l in range(num_layers):
        h = hidden[l]
        H = h.shape[-1]
        gi = x @ params["w_ih"][l].T + params["b_ih"][l]
        gh = h @ params["w_hh"][l].T + params["b_hh"][l]
        r = jax.nn.sigmoid(gi[:, :H] + gh[:, :H])
        z = jax.nn.sigmoid(gi[:, H:2 * H] + gh[:, H:2 * H])
        n = jnp.tanh(gi[:, 2 * H:] + r * gh[:, 2 * H:])
        h_new = (1.0 - z) * n + z * h
        new_hidden.append(h_new)
        x = h_new
    logits = x @ params["fc_w"].T + params["fc_b"]
    return logits, jnp.stack(new_hidden, axis=0)


# ------------------------------ main -------------------------------------- #

if __name__ == "__main__":
    output_size = 50   # vocab
    embed_size = 16
    hidden_size = 32
    num_layers = 2
    batch = 2

    key = jax.random.PRNGKey(0)
    k_params, k_tok, k_hid = jax.random.split(key, 3)

    params = init_decoder_params(k_params, output_size, embed_size, hidden_size, num_layers)
    kparams = prepare_decoder_kernel_params(params, output_size)

    input_token = jax.random.randint(k_tok, (batch,), 0, output_size, dtype=jnp.int32)
    hidden0 = 0.1 * jax.random.normal(k_hid, (num_layers, batch, hidden_size), jnp.float32)

    logits, hidden1 = decoder_forward(kparams, input_token, hidden0)
    logits = jax.block_until_ready(logits)
    hidden1 = jax.block_until_ready(hidden1)

    ref_logits, ref_hidden = decoder_forward_ref(params, input_token, hidden0)
    assert logits.shape == (batch, output_size)
    assert hidden1.shape == (num_layers, batch, hidden_size)
    assert jnp.allclose(logits, ref_logits, atol=1e-5, rtol=1e-5)
    assert jnp.allclose(hidden1, ref_hidden, atol=1e-5, rtol=1e-5)

    print("KERNEL_OK")
</pallas_src>

<mosaic_0001>
module attributes {stable_mosaic.version = 11 : i64} {
  func.func @kernel(%arg0: memref<2x1xi32, #tpu.memory_space<vmem>>, %arg1: memref<50x16xf32, #tpu.memory_space<vmem>>, %arg2: memref<2x2x128xf32, #tpu.memory_space<vmem>>, %arg3: memref<16x384xf32, #tpu.memory_space<vmem>>, %arg4: memref<128x384xf32, #tpu.memory_space<vmem>>, %arg5: memref<1x384xf32, #tpu.memory_space<vmem>>, %arg6: memref<1x128xf32, #tpu.memory_space<vmem>>, %arg7: memref<128x384xf32, #tpu.memory_space<vmem>>, %arg8: memref<128x384xf32, #tpu.memory_space<vmem>>, %arg9: memref<1x384xf32, #tpu.memory_space<vmem>>, %arg10: memref<1x128xf32, #tpu.memory_space<vmem>>, %arg11: memref<128x128xf32, #tpu.memory_space<vmem>>, %arg12: memref<1x128xf32, #tpu.memory_space<vmem>>, %arg13: memref<2x128xf32, #tpu.memory_space<vmem>>, %arg14: memref<2x2x128xf32, #tpu.memory_space<vmem>>) attributes {dimension_semantics = [], scalar_prefetch = 0 : i64, scratch_operands = 0 : i64, tpu.core_type = #tpu.core_type<tc>} {
    %c0 = arith.constant 0 : index
    %c0_0 = arith.constant 0 : index
    %0 = vector.load %arg0[%c0, %c0_0] : memref<2x1xi32, #tpu.memory_space<vmem>>, vector<2x1xi32>
    %1 = tpu.iota {dimensions = array<i32: 1>} : vector<2x50xi32>
    %2 = vector.broadcast %0 : vector<2x1xi32> to vector<2x50xi32>
    %3 = arith.cmpi eq, %1, %2 : vector<2x50xi32>
    %4 = arith.extui %3 : vector<2x50xi1> to vector<2x50xi32>
    %5 = arith.sitofp %4 : vector<2x50xi32> to vector<2x50xf32>
    %c0_1 = arith.constant 0 : index
    %c0_2 = arith.constant 0 : index
    %6 = vector.load %arg1[%c0_1, %c0_2] : memref<50x16xf32, #tpu.memory_space<vmem>>, vector<50x16xf32>
    %cst = arith.constant dense<0.000000e+00> : vector<2x16xf32>
    %7 = tpu.matmul %5, %6, %cst {dimension_numbers = #tpu.dot_dimension_numbers<[1], [0], [0], [1], [0, 0, 1, 1], [], []>} : vector<2x50xf32>, vector<50x16xf32>, vector<2x16xf32> -> vector<2x16xf32>
    %c0_3 = arith.constant 0 : index
    %c0_4 = arith.constant 0 : index
    %c0_5 = arith.constant 0 : index
    %8 = vector.load %arg2[%c0_3, %c0_4, %c0_5] : memref<2x2x128xf32, #tpu.memory_space<vmem>>, vector<1x2x128xf32>
    %9 = vector.shape_cast %8 : vector<1x2x128xf32> to vector<2x128xf32>
    %c0_6 = arith.constant 0 : index
    %c0_7 = arith.constant 0 : index
    %10 = vector.load %arg3[%c0_6, %c0_7] : memref<16x384xf32, #tpu.memory_space<vmem>>, vector<16x384xf32>
    %cst_8 = arith.constant dense<0.000000e+00> : vector<2x384xf32>
    %11 = tpu.matmul %7, %10, %cst_8 {dimension_numbers = #tpu.dot_dimension_numbers<[1], [0], [0], [1], [0, 0, 1, 1], [], []>} : vector<2x16xf32>, vector<16x384xf32>, vector<2x384xf32> -> vector<2x384xf32>
    %c0_9 = arith.constant 0 : index
    %c0_10 = arith.constant 0 : index
    %12 = vector.load %arg5[%c0_9, %c0_10] : memref<1x384xf32, #tpu.memory_space<vmem>>, vector<1x384xf32>
    %13 = vector.broadcast %12 : vector<1x384xf32> to vector<2x384xf32>
    %14 = arith.addf %11, %13 : vector<2x384xf32>
    %c0_11 = arith.constant 0 : index
    %c0_12 = arith.constant 0 : index
    %15 = vector.load %arg4[%c0_11, %c0_12] : memref<128x384xf32, #tpu.memory_space<vmem>>, vector<128x384xf32>
    %cst_13 = arith.constant dense<0.000000e+00> : vector<2x384xf32>
    %16 = tpu.matmul %9, %15, %cst_13 {dimension_numbers = #tpu.dot_dimension_numbers<[1], [0], [0], [1], [0, 0, 1, 1], [], []>} : vector<2x128xf32>, vector<128x384xf32>, vector<2x384xf32> -> vector<2x384xf32>
    %17 = vector.extract_strided_slice %14 {offsets = [0, 0], sizes = [2, 128], strides = [1, 1]} : vector<2x384xf32> to vector<2x128xf32>
    %18 = vector.extract_strided_slice %16 {offsets = [0, 0], sizes = [2, 128], strides = [1, 1]} : vector<2x384xf32> to vector<2x128xf32>
    %19 = arith.addf %17, %18 : vector<2x128xf32>
    %20 = arith.negf %19 : vector<2x128xf32>
    %21 = math.exp %20 : vector<2x128xf32>
    %cst_14 = arith.constant 1.000000e+00 : f32
    %22 = vector.broadcast %cst_14 : f32 to vector<2x128xf32>
    %23 = arith.addf %22, %21 : vector<2x128xf32>
    %24 = arith.divf %22, %23 : vector<2x128xf32>
    %25 = vector.extract_strided_slice %14 {offsets = [0, 128], sizes = [2, 128], strides = [1, 1]} : vector<2x384xf32> to vector<2x128xf32>
    %26 = vector.extract_strided_slice %16 {offsets = [0, 128], sizes = [2, 128], strides = [1, 1]} : vector<2x384xf32> to vector<2x128xf32>
    %27 = arith.addf %25, %26 : vector<2x128xf32>
    %28 = arith.negf %27 : vector<2x128xf32>
    %29 = math.exp %28 : vector<2x128xf32>
    %cst_15 = arith.constant 1.000000e+00 : f32
    %30 = vector.broadcast %cst_15 : f32 to vector<2x128xf32>
    %31 = arith.addf %30, %29 : vector<2x128xf32>
    %32 = arith.divf %30, %31 : vector<2x128xf32>
    %33 = vector.extract_strided_slice %14 {offsets = [0, 256], sizes = [2, 128], strides = [1, 1]} : vector<2x384xf32> to vector<2x128xf32>
    %34 = vector.extract_strided_slice %16 {offsets = [0, 256], sizes = [2, 128], strides = [1, 1]} : vector<2x384xf32> to vector<2x128xf32>
    %c0_16 = arith.constant 0 : index
    %c0_17 = arith.constant 0 : index
    %35 = vector.load %arg6[%c0_16, %c0_17] : memref<1x128xf32, #tpu.memory_space<vmem>>, vector<1x128xf32>
    %36 = vector.broadcast %35 : vector<1x128xf32> to vector<2x128xf32>
    %37 = arith.addf %34, %36 : vector<2x128xf32>
    %38 = arith.mulf %24, %37 : vector<2x128xf32>
    %39 = arith.addf %33, %38 : vector<2x128xf32>
    %40 = math.tanh %39 : vector<2x128xf32>
    %cst_18 = arith.constant 1.000000e+00 : f32
    %41 = vector.broadcast %cst_18 : f32 to vector<2x128xf32>
    %42 = arith.subf %41, %32 : vector<2x128xf32>
    %43 = arith.mulf %42, %40 : vector<2x128xf32>
    %44 = arith.mulf %32, %9 : vector<2x128xf32>
    %45 = arith.addf %43, %44 : vector<2x128xf32>
    %c0_19 = arith.constant 0 : index
    %c0_20 = arith.constant 0 : index
    %c0_21 = arith.constant 0 : index
    %46 = vector.load %arg14[%c0_19, %c0_20, %c0_21] : memref<2x2x128xf32, #tpu.memory_space<vmem>>, vector<1x2x128xf32>
    %47 = vector.shape_cast %46 : vector<1x2x128xf32> to vector<2x128xf32>
    %48 = vector.shape_cast %45 : vector<2x128xf32> to vector<1x2x128xf32>
    tpu.vector_store %arg14[%c0_19, %c0_20, %c0_21], %48 {strides = array<i32>} : memref<2x2x128xf32, #tpu.memory_space<vmem>>, vector<1x2x128xf32>,
    %c1 = arith.constant 1 : index
    %c0_22 = arith.constant 0 : index
    %c0_23 = arith.constant 0 : index
    %49 = vector.load %arg2[%c1, %c0_22, %c0_23] : memref<2x2x128xf32, #tpu.memory_space<vmem>>, vector<1x2x128xf32>
    %50 = vector.shape_cast %49 : vector<1x2x128xf32> to vector<2x128xf32>
    %c0_24 = arith.constant 0 : index
    %c0_25 = arith.constant 0 : index
    %51 = vector.load %arg7[%c0_24, %c0_25] : memref<128x384xf32, #tpu.memory_space<vmem>>, vector<128x384xf32>
    %cst_26 = arith.constant dense<0.000000e+00> : vector<2x384xf32>
    %52 = tpu.matmul %45, %51, %cst_26 {dimension_numbers = #tpu.dot_dimension_numbers<[1], [0], [0], [1], [0, 0, 1, 1], [], []>} : vector<2x128xf32>, vector<128x384xf32>, vector<2x384xf32> -> vector<2x384xf32>
    %c0_27 = arith.constant 0 : index
    %c0_28 = arith.constant 0 : index
    %53 = vector.load %arg9[%c0_27, %c0_28] : memref<1x384xf32, #tpu.memory_space<vmem>>, vector<1x384xf32>
    %54 = vector.broadcast %53 : vector<1x384xf32> to vector<2x384xf32>
    %55 = arith.addf %52, %54 : vector<2x384xf32>
    %c0_29 = arith.constant 0 : index
    %c0_30 = arith.constant 0 : index
    %56 = vector.load %arg8[%c0_29, %c0_30] : memref<128x384xf32, #tpu.memory_space<vmem>>, vector<128x384xf32>
    %cst_31 = arith.constant dense<0.000000e+00> : vector<2x384xf32>
    %57 = tpu.matmul %50, %56, %cst_31 {dimension_numbers = #tpu.dot_dimension_numbers<[1], [0], [0], [1], [0, 0, 1, 1], [], []>} : vector<2x128xf32>, vector<128x384xf32>, vector<2x384xf32> -> vector<2x384xf32>
    %58 = vector.extract_strided_slice %55 {offsets = [0, 0], sizes = [2, 128], strides = [1, 1]} : vector<2x384xf32> to vector<2x128xf32>
    %59 = vector.extract_strided_slice %57 {offsets = [0, 0], sizes = [2, 128], strides = [1, 1]} : vector<2x384xf32> to vector<2x128xf32>
    %60 = arith.addf %58, %59 : vector<2x128xf32>
    %61 = arith.negf %60 : vector<2x128xf32>
    %62 = math.exp %61 : vector<2x128xf32>
    %cst_32 = arith.constant 1.000000e+00 : f32
    %63 = vector.broadcast %cst_32 : f32 to vector<2x128xf32>
    %64 = arith.addf %63, %62 : vector<2x128xf32>
    %65 = arith.divf %63, %64 : vector<2x128xf32>
    %66 = vector.extract_strided_slice %55 {offsets = [0, 128], sizes = [2, 128], strides = [1, 1]} : vector<2x384xf32> to vector<2x128xf32>
    %67 = vector.extract_strided_slice %57 {offsets = [0, 128], sizes = [2, 128], strides = [1, 1]} : vector<2x384xf32> to vector<2x128xf32>
    %68 = arith.addf %66, %67 : vector<2x128xf32>
    %69 = arith.negf %68 : vector<2x128xf32>
    %70 = math.exp %69 : vector<2x128xf32>
    %cst_33 = arith.constant 1.000000e+00 : f32
    %71 = vector.broadcast %cst_33 : f32 to vector<2x128xf32>
    %72 = arith.addf %71, %70 : vector<2x128xf32>
    %73 = arith.divf %71, %72 : vector<2x128xf32>
    %74 = vector.extract_strided_slice %55 {offsets = [0, 256], sizes = [2, 128], strides = [1, 1]} : vector<2x384xf32> to vector<2x128xf32>
    %75 = vector.extract_strided_slice %57 {offsets = [0, 256], sizes = [2, 128], strides = [1, 1]} : vector<2x384xf32> to vector<2x128xf32>
    %c0_34 = arith.constant 0 : index
    %c0_35 = arith.constant 0 : index
    %76 = vector.load %arg10[%c0_34, %c0_35] : memref<1x128xf32, #tpu.memory_space<vmem>>, vector<1x128xf32>
    %77 = vector.broadcast %76 : vector<1x128xf32> to vector<2x128xf32>
    %78 = arith.addf %75, %77 : vector<2x128xf32>
    %79 = arith.mulf %65, %78 : vector<2x128xf32>
    %80 = arith.addf %74, %79 : vector<2x128xf32>
    %81 = math.tanh %80 : vector<2x128xf32>
    %cst_36 = arith.constant 1.000000e+00 : f32
    %82 = vector.broadcast %cst_36 : f32 to vector<2x128xf32>
    %83 = arith.subf %82, %73 : vector<2x128xf32>
    %84 = arith.mulf %83, %81 : vector<2x128xf32>
    %85 = arith.mulf %73, %50 : vector<2x128xf32>
    %86 = arith.addf %84, %85 : vector<2x128xf32>
    %c1_37 = arith.constant 1 : index
    %c0_38 = arith.constant 0 : index
    %c0_39 = arith.constant 0 : index
    %87 = vector.load %arg14[%c1_37, %c0_38, %c0_39] : memref<2x2x128xf32, #tpu.memory_space<vmem>>, vector<1x2x128xf32>
    %88 = vector.shape_cast %87 : vector<1x2x128xf32> to vector<2x128xf32>
    %89 = vector.shape_cast %86 : vector<2x128xf32> to vector<1x2x128xf32>
    tpu.vector_store %arg14[%c1_37, %c0_38, %c0_39], %89 {strides = array<i32>} : memref<2x2x128xf32, #tpu.memory_space<vmem>>, vector<1x2x128xf32>,
    %c0_40 = arith.constant 0 : index
    %c0_41 = arith.constant 0 : index
    %90 = vector.load %arg11[%c0_40, %c0_41] : memref<128x128xf32, #tpu.memory_space<vmem>>, vector<128x128xf32>
    %cst_42 = arith.constant dense<0.000000e+00> : vector<2x128xf32>
    %91 = tpu.matmul %86, %90, %cst_42 {dimension_numbers = #tpu.dot_dimension_numbers<[1], [0], [0], [1], [0, 0, 1, 1], [], []>} : vector<2x128xf32>, vector<128x128xf32>, vector<2x128xf32> -> vector<2x128xf32>
    %c0_43 = arith.constant 0 : index
    %c0_44 = arith.constant 0 : index
    %92 = vector.load %arg12[%c0_43, %c0_44] : memref<1x128xf32, #tpu.memory_space<vmem>>, vector<1x128xf32>
    %93 = vector.broadcast %92 : vector<1x128xf32> to vector<2x128xf32>
    %94 = arith.addf %91, %93 : vector<2x128xf32>
    %c0_45 = arith.constant 0 : index
    %c0_46 = arith.constant 0 : index
    %95 = vector.load %arg13[%c0_45, %c0_46] : memref<2x128xf32, #tpu.memory_space<vmem>>, vector<2x128xf32>
    tpu.vector_store %arg13[%c0_45, %c0_46], %94 {strides = array<i32>} : memref<2x128xf32, #tpu.memory_space<vmem>>, vector<2x128xf32>,
    return
  }
}

</mosaic_0001>

<bundles_post_ra>
// kernel: tpu_custom_call.1
= control target key start
LH: loop header
LB: loop body
LE: loop exit
PB: predicated region body
PF: predicated region fallthrough
CT: control target
= control target key end

     0   :  { %20 = vsyncpa [#allocation3], 0  ;;  %s2129_s0 = inlined_call_operand.vmem [shape: s32[2,1], index: 0, kind: input, shape index: {}]   ;;  %s2130_s1 = inlined_call_operand.vmem [shape: f32[50,16], index: 1, kind: input, shape index: {}]   ;;  %s2131_s2 = inlined_call_operand.vmem [shape: f32[2,2,128], index: 2, kind: input, shape index: {}]   ;;  %s2132_s3 = inlined_call_operand.vmem [shape: f32[16,384], index: 3, kind: input, shape index: {}]   ;;  %s2133_s4 = inlined_call_operand.hbm [shape: f32[128,384], index: 4, kind: input, shape index: {}]   ;;  %s2134_s5 = inlined_call_operand.vmem [shape: f32[1,384], index: 5, kind: input, shape index: {}]   ;;  %s2135_s6 = inlined_call_operand.vmem [shape: f32[1,128], index: 6, kind: input, shape index: {}]   ;;  %s2136_s7 = inlined_call_operand.hbm [shape: f32[128,384], index: 7, kind: input, shape index: {}]   ;;  %s2137_s8 = inlined_call_operand.hbm [shape: f32[128,384], index: 8, kind: input, shape index: {}]   ;;  %s2138_s9 = inlined_call_operand.vmem [shape: f32[1,384], index: 9, kind: input, shape index: {}]   ;;  %s2139_s10 = inlined_call_operand.vmem [shape: f32[1,128], index: 10, kind: input, shape index: {}]   ;;  %s2140_s11 = inlined_call_operand.hbm [shape: f32[128,128], index: 11, kind: input, shape index: {}]   ;;  %s2141_s12 = inlined_call_operand.vmem [shape: f32[1,128], index: 12, kind: input, shape index: {}]   ;;  %s2142_s13 = inlined_call_operand.hbm [shape: f32[2,128], index: 13, kind: output, shape index: {0}]   ;;  %s2143_s14 = inlined_call_operand.hbm [shape: f32[2,2,128], index: 14, kind: output, shape index: {1}]  }
   0x1   :  { %21 = vsyncpa [#allocation6], 0 }
   0x2   :  { %22 = vsyncpa [#allocation9], 0 }
   0x3   :  { %23 = vsyncpa [#allocation4], 0 }
   0x4   :  { %24 = vsyncpa [#allocation12], 0  ;;  %s1791_s29 = smov [#allocation5]   ;;  %s1792_s15 = smov [#allocation2]  }
   0x5   :  { %s54_s30 = sshll.u32 %s1791_s29, 4  ;;  %s38_s16 = sshll.u32 %s1792_s15, 4  ;;  %s55_s30 = int_to_ptr.vmem [resolvable:$true] %s54_s30  ;;  %s1882_s16 = int_to_ptr.vmem [resolvable:$true] %s38_s16 }
   0x6   :  { %s1649_s19 = scalar_lea.hbm %s2136_s7, 6144 }
   0x7   :  { %p1650_p0 = scmp.ne.s32.totalorder %s2136_s7, %s1649_s19  ;;  %p1653_p1 = scmp.lt.u32.totalorder %s1649_s19, %s2136_s7 }
   0x9   :  { %p1655_p2 = pnand %p1653_p1, %p1650_p0 }
   0xb   :  { %1658 = shalt.err (!%p1655_p2)
}
   0xc   :  { %s1659_s24 = scalar_lea.vmem %s55_s30, 6144  ;;  %p1664_p4 = scmp.lt.s32.totalorder %s55_s30, %s55_s30 }
   0xd   :  { %p1660_p3 = scmp.ne.s32.totalorder %s55_s30, %s1659_s24  ;;  %p1665_p5 = scmp.lt.s32.totalorder %s1659_s24, %s1659_s24 }
   0xf   :  { %p1666_p6 = por %p1665_p5, %p1664_p4 }
  0x11   :  { %p1667_p7 = pnand %p1666_p6, %p1660_p3 }
  0x13   :  { %1670 = shalt.err (!%p1667_p7)
}
  0x14   :  { %s1793_s25 = smov 384   ;;  %s1794_s26 = smov 24  }
  0x15   :  { %60 = dma.hbm_to_vmem [thread:$0]  %s2136_s7, 6144, %s55_s30, [#allocation6], %s1793_s25, %s1793_s25, %s1794_s26  }
  0x16   :  { %s1671_s17 = scalar_lea.hbm %s2133_s4, 6144 }
  0x17   :  { %p1672_p8 = scmp.ne.s32.totalorder %s2133_s4, %s1671_s17  ;;  %p1675_p9 = scmp.lt.u32.totalorder %s1671_s17, %s2133_s4 }
  0x19   :  { %p1677_p10 = pnand %p1675_p9, %p1672_p8 }
  0x1b   :  { %1680 = shalt.err (!%p1677_p10)
}
  0x1c   :  { %s1681_s22 = scalar_lea.vmem %s1882_s16, 6144  ;;  %p1686_p12 = scmp.lt.s32.totalorder %s1882_s16, %s1882_s16 }
  0x1d   :  { %p1682_p11 = scmp.ne.s32.totalorder %s1882_s16, %s1681_s22  ;;  %p1687_p13 = scmp.lt.s32.totalorder %s1681_s22, %s1681_s22 }
  0x1f   :  { %p1688_p0 = por %p1687_p13, %p1686_p12 }
  0x21   :  { %p1689_p1 = pnand %p1688_p0, %p1682_p11 }
  0x23   :  { %1692 = shalt.err (!%p1689_p1)
}
  0x24   :  { %44 = dma.hbm_to_vmem [thread:$0]  %s2133_s4, 6144, %s1882_s16, [#allocation3], %s1793_s25, %s1793_s25, %s1794_s26  }
  0x25   :  { %s1795_s23 = smov [#allocation7]   ;;  %s1796_s27 = smov [#allocation8]  }
  0x26   :  { %s66_s24 = sshll.u32 %s1795_s23, 4  ;;  %s82_s28 = sshll.u32 %s1796_s27, 4  ;;  %s67_s24 = int_to_ptr.vmem [resolvable:$true] %s66_s24  ;;  %s1919_s28 = int_to_ptr.vmem [resolvable:$true] %s82_s28 }
  0x27   :  { %s1693_s17 = scalar_lea.hbm %s2137_s8, 6144 }
  0x28   :  { %p1694_p2 = scmp.ne.s32.totalorder %s2137_s8, %s1693_s17  ;;  %p1697_p3 = scmp.lt.u32.totalorder %s1693_s17, %s2137_s8 }
  0x2a   :  { %p1699_p4 = pnand %p1697_p3, %p1694_p2 }
  0x2c   :  { %1702 = shalt.err (!%p1699_p4)
}
  0x2d   :  { %s1703_s4 = scalar_lea.vmem %s67_s24, 6144  ;;  %p1708_p6 = scmp.lt.s32.totalorder %s67_s24, %s67_s24 }
  0x2e   :  { %p1704_p5 = scmp.ne.s32.totalorder %s67_s24, %s1703_s4  ;;  %p1709_p7 = scmp.lt.s32.totalorder %s1703_s4, %s1703_s4 }
  0x30   :  { %p1710_p8 = por %p1709_p7, %p1708_p6 }
  0x32   :  { %p1711_p9 = pnand %p1710_p8, %p1704_p5 }
  0x34   :  { %1714 = shalt.err (!%p1711_p9)
}
  0x35   :  { %72 = dma.hbm_to_vmem [thread:$0]  %s2137_s8, 6144, %s67_s24, [#allocation6], %s1793_s25, %s1793_s25, %s1794_s26  }
  0x36   :  { %s1715_s23 = scalar_lea.hbm %s2140_s11, 2048 }
  0x37   :  { %p1716_p10 = scmp.ne.s32.totalorder %s2140_s11, %s1715_s23  ;;  %p1719_p11 = scmp.lt.u32.totalorder %s1715_s23, %s2140_s11 }
  0x39   :  { %p1721_p12 = pnand %p1719_p11, %p1716_p10 }
  0x3b   :  { %1724 = shalt.err (!%p1721_p12)
}
  0x3c   :  { %s1725_s18 = scalar_lea.vmem %s1919_s28, 2048  ;;  %p1730_p0 = scmp.lt.s32.totalorder %s1919_s28, %s1919_s28 }
  0x3d   :  { %p1726_p13 = scmp.ne.s32.totalorder %s1919_s28, %s1725_s18  ;;  %p1731_p1 = scmp.lt.s32.totalorder %s1725_s18, %s1725_s18 }
  0x3f   :  { %p1732_p2 = por %p1731_p1, %p1730_p0 }
  0x41   :  { %p1733_p3 = pnand %p1732_p2, %p1726_p13 }
  0x43   :  { %1736 = shalt.err (!%p1733_p3)
}
  0x44   :  { %s1797_s8 = smov 128   ;;  %s1798_s25 = smov 8  }
  0x45   :  { %88 = dma.hbm_to_vmem [thread:$0]  %s2140_s11, 2048, %s1919_s28, [#allocation9], %s1797_s8, %s1797_s8, %s1798_s25  }
  0x46   :  { %1781 = dma.done.wait [#allocation3], 6144  }
  0x47   :  { %1782 = vsyncadd [#allocation3], 4294961152 }
  0x48   :  { %1783 = dma.done.wait [#allocation6], 12288  }
  0x49   :  { %1784 = vsyncadd [#allocation6], 4294955008 }
  0x4a   :  { %1785 = dma.done.wait [#allocation9], 2048  }
  0x4b   :  { %1786 = vsyncadd [#allocation9], 4294965248  ;;  %v1799_v0 = vmov 0   ;;  %v1800_v1 = vmov 0.0|0.0   ;;  %v1801_v2 = vmov 0.0   ;;  %v112_v4 = vld [vmem:[%s2130_s1] sm:$0xff]  ;;  %v104_v62 = vlaneseq }
  0x4c   :  { %1628 = vset.pattern.permute.xlu0 %v1799_v0  ;;  %1396 = vmatprep.subr.bf16.mxu0 %v1800_v1  ;;  %v103_v3 = vld [vmem:[%s2129_s0] sm:$0x3]  ;;  %v113_v5 = vld [vmem:[%s2130_s1 + $0x8] sm:$0xff]  ;;  %v114_v7 = vld [vmem:[%s2130_s1 + $0x10] sm:$0xff]  ;;  %vm1802_vm0 = vmmov 0   ;;  %vm123_vm1 = vcmask 1041408  }
  0x4d   :  { %478 = vmatprep.mubr.f32.mxu1 %v1801_v2  ;;  %107 = vperm.xlu0 %1628, %v103_v3   ;;  %v1397_v6 = vpack.c.bf16 %v113_v5, %v112_v4  ;;  %v115_v8 = vld [vmem:[%s2130_s1 + $0x18] sm:$0xff]  ;;  %v116_v9 = vld [vmem:[%s2130_s1 + $0x20] sm:$0xff]  ;;  %v117_v10 = vld [vmem:[%s2130_s1 + $0x28] sm:$0xff]  ;;  %v105_v63 = vand.u32 127, %v104_v62  ;;  %vm119_vm2 = vcmask 408576   ;;  %vm221_vm4 = vcmask 130048  }
  0x4e   :  { %1246 = vmatprep.mubr.msk.f32.mxu0 %vm1802_vm0, %v1801_v2  ;;  %v1400_v11 = vpack.c.bf16 %v115_v8, %v114_v7  ;;  %v367_v12 = vld [vmem:[#allocation2 + $0x8] sm:$0xff]  ;;  %v370_v13 = vld [vmem:[#allocation2 + $0x20] sm:$0xff]  ;;  %v369_v16 = vld [vmem:[#allocation2 + $0x18] sm:$0xff]  ;;  %v1403_v25 = vpack.c.bf16 %v117_v10, %v116_v9 }
  0x4f   :  { %1398 = vmatpush3.bf16.msra.mxu0 %v1397_v6  ;;  %v366_v14 = vld [vmem:[#allocation2] sm:$0xff]  ;;  %v1412_v15 = vpack.c.bf16 %v370_v13, %v367_v12  ;;  %v373_v17 = vld [vmem:[#allocation2 + $0x38] sm:$0xff]  ;;  %v376_v18 = vld [vmem:[#allocation2 + $0x50] sm:$0xff] }
  0x50   :  { %1399 = vmatprep.subr.bf16.mxu0 %v1800_v1  ;;  %v1414_v19 = vpack.c.bf16 %v369_v16, %v366_v14  ;;  %v1416_v20 = vpack.c.bf16 %v376_v18, %v373_v17  ;;  %v372_v21 = vld [vmem:[#allocation2 + $0x30] sm:$0xff]  ;;  %v375_v22 = vld [vmem:[#allocation2 + $0x48] sm:$0xff]  ;;  %v382_v24 = vld [vmem:[#allocation2 + $0x80] sm:$0xff] }
  0x51   :  { %v379_v23 = vld [vmem:[#allocation2 + $0x68] sm:$0xff]  ;;  %1413 = vmatprep.subr.bf16.mxu1 %v1412_v15  ;;  %v1418_v26 = vpack.c.bf16 %v375_v22, %v372_v21  ;;  %v378_v28 = vld [vmem:[#allocation2 + $0x60] sm:$0xff]  ;;  %v381_v29 = vld [vmem:[#allocation2 + $0x78] sm:$0xff] }
  0x52   :  { %1415 = vmatpush1.bf16.msra.mxu1 %v1414_v19  ;;  %v1420_v27 = vpack.c.bf16 %v382_v24, %v379_v23  ;;  %v385_v30 = vld [vmem:[#allocation2 + $0x98] sm:$0xff]  ;;  %v388_v31 = vld [vmem:[#allocation2 + $0xb0] sm:$0xff]  ;;  %v1422_v33 = vpack.c.bf16 %v381_v29, %v378_v28  ;;  %v387_v37 = vld [vmem:[#allocation2 + $0xa8] sm:$0xff] }
  0x53   :  { %1401 = vmatpush3.bf16.msra.mxu0 %v1400_v11  ;;  %1417 = vmatprep.subr.bf16.mxu1 %v1416_v20  ;;  %v118_v32 = vld [vmem:[%s2130_s1 + $0x30] sm:$0x3]  ;;  %v199_v34 = vld [vmem:[%s2132_s3 + $0x8] sm:$0xff]  ;;  %v1424_v35 = vpack.c.bf16 %v388_v31, %v385_v30  ;;  %v202_v38 = vld [vmem:[%s2132_s3 + $0x20] sm:$0xff] }
  0x54   :  { %1402 = vmatprep.subr.bf16.mxu0 %v1800_v1  ;;  %v384_v36 = vld [vmem:[#allocation2 + $0x90] sm:$0xff]  ;;  %v391_v39 = vld [vmem:[#allocation2 + $0xc8] sm:$0xff]  ;;  %v394_v40 = vld [vmem:[#allocation2 + $0xe0] sm:$0xff]  ;;  %v1405_v41 = vpack.c.bf16 %v202_v38, %v199_v34 }
  0x55   :  { %v1426_v42 = vpack.c.bf16 %v387_v37, %v384_v36  ;;  %v1428_v43 = vpack.c.bf16 %v394_v40, %v391_v39  ;;  %v390_v44 = vld [vmem:[#allocation2 + $0xc0] sm:$0xff]  ;;  %v393_v45 = vld [vmem:[#allocation2 + $0xd8] sm:$0xff]  ;;  %v400_v47 = vld [vmem:[#allocation2 + $0x110] sm:$0xff] }
  0x56   :  { %1419 = vmatpush1.bf16.msra.mxu1 %v1418_v26  ;;  %v397_v46 = vld [vmem:[#allocation2 + $0xf8] sm:$0xff]  ;;  %v1430_v48 = vpack.c.bf16 %v393_v45, %v390_v44  ;;  %v396_v50 = vld [vmem:[#allocation2 + $0xf0] sm:$0xff]  ;;  %v399_v51 = vld [vmem:[#allocation2 + $0x108] sm:$0xff] }
  0x57   :  { %1404 = vmatpush3.bf16.msra.mxu0 %v1403_v25  ;;  %1421 = vmatprep.subr.bf16.mxu1 %v1420_v27  ;;  %v1432_v49 = vpack.c.bf16 %v400_v47, %v397_v46  ;;  %v403_v52 = vld [vmem:[#allocation2 + $0x128] sm:$0xff]  ;;  %v406_v53 = vld [vmem:[#allocation2 + $0x140] sm:$0xff]  ;;  %v1434_v54 = vpack.c.bf16 %v399_v51, %v396_v50  ;;  %v405_v57 = vld [vmem:[#allocation2 + $0x138] sm:$0xff] }
  0x58   :  { %1244 = vmatprep.subr.mxu0 %v1801_v2  ;;  %v1436_v55 = vpack.c.bf16 %v406_v53, %v403_v52  ;;  %v402_v56 = vld [vmem:[#allocation2 + $0x120] sm:$0xff]  ;;  %v409_v58 = vld [vmem:[#allocation2 + $0x158] sm:$0xff]  ;;  %v412_v59 = vld [vmem:[#allocation2 + $0x170] sm:$0xff] }
  0x59   :  { %v1438_v60 = vpack.c.bf16 %v405_v57, %v402_v56  ;;  %v1440_v61 = vpack.c.bf16 %v412_v59, %v409_v58  ;;  %v198_v0 = vld [vmem:[%s2132_s3] sm:$0xff]  ;;  %v201_v3 = vld [vmem:[%s2132_s3 + $0x18] sm:$0xff]  ;;  %v408_v7 = vld [vmem:[#allocation2 + $0x150] sm:$0xff] }
  0x5a   :  { %1423 = vmatpush1.bf16.msra.mxu1 %v1422_v33  ;;  %v1407_v5 = vpack.c.bf16 %v201_v3, %v198_v0  ;;  %v411_v8 = vld [vmem:[#allocation2 + $0x168] sm:$0xff]  ;;  %v200_v11 = vld [vmem:[%s2132_s3 + $0x10] sm:$0xff]  ;;  %v203_v12 = vld [vmem:[%s2132_s3 + $0x28] sm:$0xff] }
  0x5b   :  { %1245 = vmatpush3.msk.msra.mxu0 %vm123_vm1, %v118_v32  ;;  %1425 = vmatprep.subr.bf16.mxu1 %v1424_v35  ;;  %v1442_v9 = vpack.c.bf16 %v411_v8, %v408_v7  ;;  %v2003_v10 = vld [vmem:[%s2131_s2] sm:$0x3]  ;;  %v1410_v13 = vpack.c.bf16 %v203_v12, %v200_v11  ;;  %v368_v14 = vld [vmem:[#allocation2 + $0x10] sm:$0xff]  ;;  %v374_v19 = vld [vmem:[#allocation2 + $0x40] sm:$0xff] }
  0x5c   :  { %1406 = vmatprep.subr.bf16.mxu0 %v1405_v41  ;;  %v371_v15 = vld [vmem:[#allocation2 + $0x28] sm:$0xff]  ;;  %v377_v20 = vld [vmem:[#allocation2 + $0x58] sm:$0xff]  ;;  %v380_v22 = vld [vmem:[#allocation2 + $0x70] sm:$0xff] }
  0x5d   :  { %v1445_v18 = vpack.c.bf16 %v371_v15, %v368_v14  ;;  %v1448_v21 = vpack.c.bf16 %v377_v20, %v374_v19  ;;  %v383_v23 = vld [vmem:[#allocation2 + $0x88] sm:$0xff]  ;;  %v386_v25 = vld [vmem:[#allocation2 + $0xa0] sm:$0xff]  ;;  %v389_v26 = vld [vmem:[#allocation2 + $0xb8] sm:$0xff] }
  0x5e   :  { %1427 = vmatpush1.bf16.msra.mxu1 %v1426_v42  ;;  %v1451_v24 = vpack.c.bf16 %v383_v23, %v380_v22  ;;  %v1454_v27 = vpack.c.bf16 %v389_v26, %v386_v25  ;;  %v392_v28 = vld [vmem:[#allocation2 + $0xd0] sm:$0xff]  ;;  %v395_v29 = vld [vmem:[#allocation2 + $0xe8] sm:$0xff]  ;;  %v398_v31 = vld [vmem:[#allocation2 + $0x100] sm:$0xff] }
  0x5f   :  { %1429 = vmatprep.subr.bf16.mxu1 %v1428_v43  ;;  %v1457_v30 = vpack.c.bf16 %v395_v29, %v392_v28  ;;  %v401_v32 = vld [vmem:[#allocation2 + $0x118] sm:$0xff]  ;;  %v404_v34 = vld [vmem:[#allocation2 + $0x130] sm:$0xff]  ;;  %v407_v35 = vld [vmem:[#allocation2 + $0x148] sm:$0xff] }
  0x60   :  { %v1460_v33 = vpack.c.bf16 %v401_v32, %v398_v31  ;;  %v1463_v36 = vpack.c.bf16 %v407_v35, %v404_v34  ;;  %v410_v37 = vld [vmem:[#allocation2 + $0x160] sm:$0xff]  ;;  %v413_v38 = vld [vmem:[#allocation2 + $0x178] sm:$0xff]  ;;  %v588_v42 = vld [vmem:[#allocation5 + $0x8] sm:$0xff] }
  0x61   :  { %v1466_v39 = vpack.c.bf16 %v413_v38, %v410_v37  ;;  %v591_v43 = vld [vmem:[#allocation5 + $0x20] sm:$0xff]  ;;  %v590_v46 = vld [vmem:[#allocation5 + $0x18] sm:$0xff]  ;;  %v589_v47 = vld [vmem:[#allocation5 + $0x10] sm:$0xff] }
  0x62   :  { %1431 = vmatpush1.bf16.msra.mxu1 %v1430_v48  ;;  %v587_v44 = vld [vmem:[#allocation5] sm:$0xff]  ;;  %v1468_v45 = vpack.c.bf16 %v591_v43, %v588_v42  ;;  %v592_v48 = vld [vmem:[#allocation5 + $0x28] sm:$0xff]  ;;  %v594_v51 = vld [vmem:[#allocation5 + $0x38] sm:$0xff] }
  0x63   :  { %1433 = vmatprep.subr.bf16.mxu1 %v1432_v49  ;;  %v1470_v49 = vpack.c.bf16 %v590_v46, %v587_v44  ;;  %v1501_v50 = vpack.c.bf16 %v592_v48, %v589_v47  ;;  %v597_v52 = vld [vmem:[#allocation5 + $0x50] sm:$0xff]  ;;  %v595_v56 = vld [vmem:[#allocation5 + $0x40] sm:$0xff]  ;;  %v598_v57 = vld [vmem:[#allocation5 + $0x58] sm:$0xff] }
  0x64   :  { %v593_v53 = vld [vmem:[#allocation5 + $0x30] sm:$0xff]  ;;  %v1504_v59 = vpack.c.bf16 %v598_v57, %v595_v56  ;;  %v602_v3 = vld [vmem:[#allocation5 + $0x78] sm:$0xff]  ;;  %v607_v15 = vld [vmem:[#allocation5 + $0xa0] sm:$0xff] }
  0x65   :  { %v606_v8 = vld [vmem:[#allocation5 + $0x98] sm:$0xff]  ;;  %v605_v12 = vld [vmem:[#allocation5 + $0x90] sm:$0xff]  ;;  %v615_v19 = vld [vmem:[#allocation5 + $0xe0] sm:$0xff] }
  0x66   :  { %1435 = vmatpush1.bf16.msra.mxu1 %v1434_v54  ;;  %v1472_v54 = vpack.c.bf16 %v597_v52, %v594_v51  ;;  %v614_v22 = vld [vmem:[#allocation5 + $0xd8] sm:$0xff]  ;;  %v616_v25 = vld [vmem:[#allocation5 + $0xe8] sm:$0xff]  ;;  %v621_v28 = vld [vmem:[#allocation5 + $0x110] sm:$0xff] }
  0x67   :  { %1437 = vmatprep.subr.bf16.mxu1 %v1436_v55  ;;  %v596_v55 = vld [vmem:[#allocation5 + $0x48] sm:$0xff]  ;;  %v619_v32 = vld [vmem:[#allocation5 + $0x100] sm:$0xff]  ;;  %v622_v34 = vld [vmem:[#allocation5 + $0x118] sm:$0xff] }
  0x68   :  { %v1474_v58 = vpack.c.bf16 %v596_v55, %v593_v53  ;;  %v620_v31 = vld [vmem:[#allocation5 + $0x108] sm:$0xff]  ;;  %v1516_v37 = vpack.c.bf16 %v622_v34, %v619_v32  ;;  %v626_v42 = vld [vmem:[#allocation5 + $0x138] sm:$0xff]  ;;  %v625_v43 = vld [vmem:[#allocation5 + $0x130] sm:$0xff] }
  0x69   :  { %v624_v35 = vld [vmem:[#allocation5 + $0x128] sm:$0xff]  ;;  %v630_v46 = vld [vmem:[#allocation5 + $0x158] sm:$0xff]  ;;  %v633_v47 = vld [vmem:[#allocation5 + $0x170] sm:$0xff] }
  0x6a   :  { %1439 = vmatpush1.bf16.msra.mxu1 %v1438_v60  ;;  %v600_v60 = vld [vmem:[#allocation5 + $0x68] sm:$0xff]  ;;  %v631_v52 = vld [vmem:[#allocation5 + $0x160] sm:$0xff]  ;;  %v634_v53 = vld [vmem:[#allocation5 + $0x178] sm:$0xff] }
  0x6b   :  { %1441 = vmatprep.subr.bf16.mxu1 %v1440_v61  ;;  %v603_v61 = vld [vmem:[#allocation5 + $0x80] sm:$0xff]  ;;  %v632_v51 = vld [vmem:[#allocation5 + $0x168] sm:$0xff]  ;;  %v1522_v57 = vpack.c.bf16 %v634_v53, %v631_v52  ;;  %v803_v34 = vld [vmem:[#allocation7 + $0x50] sm:$0xff] }
  0x6c   :  { %v1476_v0 = vpack.c.bf16 %v603_v61, %v600_v60  ;;  %v797_v55 = vld [vmem:[#allocation7 + $0x20] sm:$0xff]  ;;  %v204_v61 = vld [vmem:[%s2134_s5] sm:$0x7]  ;;  %v808_v52 = vld [vmem:[#allocation7 + $0x78] sm:$0xff] }
  0x6d   :  { %v807_v53 = vld [vmem:[#allocation7 + $0x70] sm:$0xff] }
  0x6e   :  { %1443 = vmatpush1.bf16.msra.mxu1 %v1442_v9  ;;  %v609_v9 = vld [vmem:[#allocation5 + $0xb0] sm:$0xff] }
  0x6f   :  { %1469 = vmatprep.subr.bf16.mxu1 %v1468_v45  ;;  %v1480_v11 = vpack.c.bf16 %v609_v9, %v606_v8  ;;  %v628_v45 = vld [vmem:[#allocation5 + $0x148] sm:$0xff] }
  0x70   :  { %v1519_v48 = vpack.c.bf16 %v628_v45, %v625_v43  ;;  %v801_v45 = vld [vmem:[#allocation7 + $0x40] sm:$0xff] }
  0x71   :  { %479 = vmatmul.mubr.f32.vlgmr.msra.gmra.mrb[0].mxu1 %v2003_v10 }
  0x72   :  { %716 = vmatprep.mubr.f32.mxu1 %v1801_v2  ;;  %1471 = vmatpush1.bf16.msra.mxu1 %v1470_v49  ;;  %v1496_v49 = vpack.c.bf16 %v633_v47, %v630_v46  ;;  %v804_v46 = vld [vmem:[#allocation7 + $0x58] sm:$0xff]  ;;  %v806_v47 = vld [vmem:[#allocation7 + $0x68] sm:$0xff] }
  0x73   :  { %1473 = vmatprep.subr.bf16.mxu1 %v1472_v54  ;;  %v794_v54 = vld [vmem:[#allocation7 + $0x8] sm:$0xff] }
  0x76   :  { %1475 = vmatpush1.bf16.msra.mxu1 %v1474_v58  ;;  %v1524_v58 = vpack.c.bf16 %v797_v55, %v794_v54  ;;  %v810_v54 = vld [vmem:[#allocation7 + $0x88] sm:$0xff]  ;;  %v812_v55 = vld [vmem:[#allocation7 + $0x98] sm:$0xff] }
  0x77   :  { %1477 = vmatprep.subr.bf16.mxu1 %v1476_v0 }
  0xcc   :  { %v108_v4 = vpop.permute.xlu0 %107 }
  0xcd   :  { %vm109_vm3 = vcmp.eq.s32.totalorder %v105_v63, %v108_v4  ;;  %v599_v63 = vld [vmem:[#allocation5 + $0x60] sm:$0xff]  ;;  %v601_v4 = vld [vmem:[#allocation5 + $0x70] sm:$0xff] }
  0xce   :  { %v1140_v6 = vsel %vm109_vm3, 1.0, %v1801_v2 }
  0xcf   :  { %1247 = vmatmul.mubr.msk.f32.vlgmr.msra.gmra.mrb[0].mxu0 %vm119_vm2, %v1140_v6  ;;  %v1478_v6 = vpack.c.bf16 %v602_v3, %v599_v63 }
  0xd0   :  { %1408 = vmatpush1.bf16.msra.mxu0 %v1407_v5  ;;  %289 = vmatprep.mubr.f32.mxu0 %v1801_v2  ;;  %v604_v5 = vld [vmem:[#allocation5 + $0x88] sm:$0xff] }
  0xd1   :  { %1409 = vmatprep.subr.bf16.mxu0 %v1800_v1  ;;  %v1507_v7 = vpack.c.bf16 %v604_v5, %v601_v4  ;;  %1479 = vmatpush1.bf16.msra.mxu1 %v1478_v6 }
  0xd2   :  { %1481 = vmatprep.subr.bf16.mxu1 %v1480_v11 }
 0x144   :  { %v2029_v40 = vpop.f32.mrb[0].mxu1 }
 0x145   :  { %v2031_v41 = vpop.f32.mrb[1].mxu1 }
 0x1a2   :  { %v193_v16 = vpop.f32.mrb[0].mxu0 }
 0x1a3   :  { %v1248_v17 = vpop.f32.mrb[1].mxu0  ;;  %1143 = vmatmul.mubr.msk.f32.vlgmr.msra.gmra.mrb[2].mxu0 %vm221_vm4, %v193_v16 }
 0x1a4   :  { %1411 = vmatpush3.bf16.msra.mxu0 %v1410_v13  ;;  %1253 = vmatprep.mubr.msk.f32.mxu0 %vm1802_vm0, %v1801_v2  ;;  %v608_v13 = vld [vmem:[#allocation5 + $0xa8] sm:$0xff] }
 0x1a5   :  { %1444 = vmatprep.subr.bf16.mxu0 %v1800_v1  ;;  %v1482_v14 = vpack.c.bf16 %v608_v13, %v605_v12 }
 0x1a7   :  { %1254 = vmatmul.mubr.msk.f32.vlgmr.msra.gmra.mrb[4].mxu0 %vm221_vm4, %v193_v16  ;;  %v610_v16 = vld [vmem:[#allocation5 + $0xb8] sm:$0xff]  ;;  %1483 = vmatpush1.bf16.msra.mxu1 %v1482_v14 }
 0x1a8   :  { %1446 = vmatpush3.bf16.msra.mxu0 %v1445_v18  ;;  %1288 = vmatprep.mubr.msk.f32.mxu0 %vm1802_vm0, %v1801_v2  ;;  %v1510_v17 = vpack.c.bf16 %v610_v16, %v607_v15  ;;  %v612_v18 = vld [vmem:[#allocation5 + $0xc8] sm:$0xff] }
 0x1a9   :  { %1447 = vmatprep.subr.bf16.mxu0 %v1800_v1  ;;  %v1484_v20 = vpack.c.bf16 %v615_v19, %v612_v18  ;;  %v1147_v18 = vld [vmem:[%s2135_s6] ss:$0 sm:$0xff] }
 0x1ab   :  { %1485 = vmatprep.subr.bf16.mxu1 %v1484_v20 }
 0x1ac   :  { %1449 = vmatpush3.bf16.msra.mxu0 %v1448_v21  ;;  %v611_v21 = vld [vmem:[#allocation5 + $0xc0] sm:$0xff] }
 0x1ad   :  { %1450 = vmatprep.subr.bf16.mxu0 %v1800_v1  ;;  %v1486_v23 = vpack.c.bf16 %v614_v22, %v611_v21 }
 0x1af   :  { %1487 = vmatpush1.bf16.msra.mxu1 %v1486_v23 }
 0x1b0   :  { %1452 = vmatpush3.bf16.msra.mxu0 %v1451_v24  ;;  %v613_v24 = vld [vmem:[#allocation5 + $0xd0] sm:$0xff] }
 0x1b1   :  { %1453 = vmatprep.subr.bf16.mxu0 %v1800_v1  ;;  %v1513_v26 = vpack.c.bf16 %v616_v25, %v613_v24 }
 0x1b4   :  { %1455 = vmatpush3.bf16.msra.mxu0 %v1454_v27  ;;  %v618_v27 = vld [vmem:[#allocation5 + $0xf8] sm:$0xff] }
 0x1b5   :  { %1456 = vmatprep.subr.bf16.mxu0 %v1800_v1  ;;  %v1488_v29 = vpack.c.bf16 %v621_v28, %v618_v27  ;;  %v793_v27 = vld [vmem:[#allocation7] sm:$0xff] }
 0x1b7   :  { %1489 = vmatprep.subr.bf16.mxu1 %v1488_v29  ;;  %v796_v29 = vld [vmem:[#allocation7 + $0x18] sm:$0xff] }
 0x1b8   :  { %1458 = vmatpush3.bf16.msra.mxu0 %v1457_v30  ;;  %v617_v30 = vld [vmem:[#allocation5 + $0xf0] sm:$0xff] }
 0x1b9   :  { %1459 = vmatprep.subr.bf16.mxu0 %v1800_v1 }
 0x1bc   :  { %1461 = vmatpush3.bf16.msra.mxu0 %v1460_v33  ;;  %v1490_v33 = vpack.c.bf16 %v620_v31, %v617_v30  ;;  %v795_v30 = vld [vmem:[#allocation7 + $0x10] sm:$0xff]  ;;  %v798_v31 = vld [vmem:[#allocation7 + $0x28] sm:$0xff] }
 0x1bd   :  { %1462 = vmatprep.subr.bf16.mxu0 %v1800_v1 }
 0x1be   :  { %1491 = vmatpush1.bf16.msra.mxu1 %v1490_v33  ;;  %v800_v33 = vld [vmem:[#allocation7 + $0x38] sm:$0xff] }
 0x1bf   :  { %v1528_v43 = vpack.c.bf16 %v803_v34, %v800_v33  ;;  %v839_v33 = vld [vmem:[#allocation7 + $0x170] sm:$0xff] }
 0x1c0   :  { %1464 = vmatpush3.bf16.msra.mxu0 %v1463_v36  ;;  %v627_v36 = vld [vmem:[#allocation5 + $0x140] sm:$0xff] }
 0x1c1   :  { %1465 = vmatprep.subr.bf16.mxu0 %v1800_v1  ;;  %v1492_v38 = vpack.c.bf16 %v627_v36, %v624_v35 }
 0x1c3   :  { %1493 = vmatprep.subr.bf16.mxu1 %v1492_v38  ;;  %v799_v38 = vld [vmem:[#allocation7 + $0x30] sm:$0xff] }
 0x1c4   :  { %1467 = vmatpush3.bf16.msra.mxu0 %v1466_v39  ;;  %v623_v39 = vld [vmem:[#allocation5 + $0x120] sm:$0xff] }
 0x1c5   :  { %1500 = vmatprep.subr.bf16.mxu0 %v1800_v1  ;;  %v1494_v44 = vpack.c.bf16 %v626_v42, %v623_v39  ;;  %v1557_v39 = vpack.c.bf16 %v798_v31, %v795_v30  ;;  %v831_v30 = vld [vmem:[#allocation7 + $0x130] sm:$0xff]  ;;  %v834_v31 = vld [vmem:[#allocation7 + $0x148] sm:$0xff] }
 0x1c7   :  { %1289 = vmatmul.mubr.f32.vlgmr.msra.gmra.mrb[6].mxu0 %v2003_v10  ;;  %1495 = vmatpush1.bf16.msra.mxu1 %v1494_v44  ;;  %v802_v44 = vld [vmem:[#allocation7 + $0x48] sm:$0xff] }
 0x1c8   :  { %1323 = vmatprep.mubr.msk.f32.mxu0 %vm1802_vm0, %v1801_v2  ;;  %1502 = vmatpush3.bf16.msra.mxu0 %v1501_v50  ;;  %v629_v50 = vld [vmem:[#allocation5 + $0x150] sm:$0xff] }
 0x1c9   :  { %1503 = vmatprep.subr.bf16.mxu0 %v1800_v1  ;;  %v1498_v56 = vpack.c.bf16 %v632_v51, %v629_v50  ;;  %1497 = vmatprep.subr.bf16.mxu1 %v1496_v49  ;;  %v1530_v49 = vpack.c.bf16 %v802_v44, %v799_v38  ;;  %v805_v50 = vld [vmem:[#allocation7 + $0x60] sm:$0xff]  ;;  %v1560_v51 = vpack.c.bf16 %v804_v46, %v801_v45  ;;  %v838_v38 = vld [vmem:[#allocation7 + $0x168] sm:$0xff] }
 0x1ca   :  { %v2075_v45 = vld [vmem:[%s2131_s2 + $0x2] sm:$0x3]  ;;  %v1013_v46 = vld [vmem:[#allocation8] sm:$0xff] }
 0x1cb   :  { %1499 = vmatpush1.bf16.msra.mxu1 %v1498_v56  ;;  %v815_v56 = vld [vmem:[#allocation7 + $0xb0] sm:$0xff] }
 0x1cc   :  { %1505 = vmatpush3.bf16.msra.mxu0 %v1504_v59  ;;  %1525 = vmatprep.subr.bf16.mxu1 %v1524_v58  ;;  %v2042_v59 = vshrl.u32 %v104_v62, 7  ;;  %v811_v58 = vld [vmem:[#allocation7 + $0x90] sm:$0xff] }
 0x1cd   :  { %1506 = vmatprep.subr.bf16.mxu0 %v1800_v1 }
 0x1ce   :  { %v208_v60 = vsub.s32 0, %v2042_v59  ;;  %v212_v63 = vsub.s32 1, %v2042_v59  ;;  %v216_v16 = vsub.s32 2, %v2042_v59 }
 0x1d0   :  { %1508 = vmatpush3.bf16.msra.mxu0 %v1507_v7  ;;  %v209_v0 = vrot.slane %v204_v61, %v208_v60  ;;  %v213_v3 = vrot.slane %v204_v61, %v212_v63 }
 0x1d1   :  { %1509 = vmatprep.subr.bf16.mxu0 %v1800_v1 }
 0x1d4   :  { %1511 = vmatpush3.bf16.msra.mxu0 %v1510_v17 }
 0x1d5   :  { %1512 = vmatprep.subr.bf16.mxu0 %v1800_v1 }
 0x1d8   :  { %1514 = vmatpush3.bf16.msra.mxu0 %v1513_v26 }
 0x1d9   :  { %1515 = vmatprep.subr.bf16.mxu0 %v1800_v1 }
 0x1dc   :  { %1517 = vmatpush3.bf16.msra.mxu0 %v1516_v37  ;;  %v1526_v37 = vpack.c.bf16 %v796_v29, %v793_v27  ;;  %v832_v29 = vld [vmem:[#allocation7 + $0x138] sm:$0xff] }
 0x1dd   :  { %1518 = vmatprep.subr.bf16.mxu0 %v1800_v1 }
 0x1e0   :  { %1520 = vmatpush3.bf16.msra.mxu0 %v1519_v48  ;;  %v809_v48 = vld [vmem:[#allocation7 + $0x80] sm:$0xff] }
 0x1e1   :  { %1521 = vmatprep.subr.bf16.mxu0 %v1800_v1 }
 0x1e4   :  { %1523 = vmatpush3.bf16.msra.mxu0 %v1522_v57  ;;  %v1534_v57 = vpack.c.bf16 %v808_v52, %v805_v50  ;;  %v1016_v50 = vld [vmem:[#allocation8 + $0x18] sm:$0xff]  ;;  %v1018_v52 = vld [vmem:[#allocation8 + $0x28] sm:$0xff] }
 0x1e5   :  { %1556 = vmatprep.subr.bf16.mxu0 %v1800_v1 }
 0x276   :  { %v291_v4 = vpop.f32.mrb[2].mxu0 }
 0x277   :  { %v292_v5 = vadd.f32 %v291_v4, %v209_v0  ;;  %v293_v6 = vpop.f32.mrb[3].mxu0  ;;  %v1536_v0 = vpack.c.bf16 %v815_v56, %v812_v55  ;;  %v813_v4 = vld [vmem:[#allocation7 + $0xa0] sm:$0xff] }
 0x278   :  { %v294_v7 = vadd.f32 %v293_v6, %v213_v3  ;;  %v814_v3 = vld [vmem:[#allocation7 + $0xa8] sm:$0xff]  ;;  %v1021_v56 = vld [vmem:[#allocation8 + $0x40] sm:$0xff] }
 0x279   :  { %v555_v62 = vadd.f32 %v2029_v40, %v292_v5  ;;  %v217_v40 = vrot.slane %v204_v61, %v216_v16  ;;  %v1563_v61 = vpack.c.bf16 %v810_v54, %v807_v53  ;;  %v816_v5 = vld [vmem:[#allocation7 + $0xb8] sm:$0xff]  ;;  %v818_v6 = vld [vmem:[#allocation7 + $0xc8] sm:$0xff]  ;;  %v1019_v54 = vld [vmem:[#allocation8 + $0x30] sm:$0xff] }
 0x27a   :  { %v562_v8 = vadd.f32 %v2031_v41, %v294_v7  ;;  %v362_v9 = vpop.f32.mrb[4].mxu0  ;;  %v821_v7 = vld [vmem:[#allocation7 + $0xe0] sm:$0xff] }
 0x27b   :  { %v1255_v11 = vpop.f32.mrb[5].mxu0  ;;  %v1145_v12 = vmul.f32 -1.442695, %v555_v62  ;;  %v363_v23 = vadd.f32 %v362_v9, %v217_v40  ;;  %v1538_v62 = vpack.c.bf16 %v814_v3, %v811_v58  ;;  %v1566_v9 = vpack.c.bf16 %v816_v5, %v813_v4  ;;  %v1025_v4 = vld [vmem:[#allocation8 + $0x60] sm:$0xff]  ;;  %v1026_v5 = vld [vmem:[#allocation8 + $0x68] sm:$0xff] }
 0x27c   :  { %v1146_v13 = vmul.f32 -1.442695, %v562_v8  ;;  %v817_v8 = vld [vmem:[#allocation7 + $0xc0] sm:$0xff]  ;;  %v1540_v11 = vpack.c.bf16 %v821_v7, %v818_v6  ;;  %v1599_v6 = vpack.c.bf16 %v1026_v5, %v1025_v4  ;;  %v1027_v7 = vld [vmem:[#allocation8 + $0x70] sm:$0xff] }
 0x27d   :  { %1629 = vpow2.f32 %v1145_v12  ;;  %v820_v12 = vld [vmem:[#allocation7 + $0xd8] sm:$0xff] }
 0x27e   :  { %1631 = vpow2.f32 %v1146_v13  ;;  %v819_v13 = vld [vmem:[#allocation7 + $0xd0] sm:$0xff] }
 0x287   :  { %v1630_v14 = vpop.eup %1629 }
 0x288   :  { %v559_v15 = vadd.f32 1.0, %v1630_v14  ;;  %v1632_v17 = vpop.eup %1631  ;;  %v822_v14 = vld [vmem:[#allocation7 + $0xe8] sm:$0xff] }
 0x289   :  { %v566_v19 = vadd.f32 1.0, %v1632_v17  ;;  %v827_v17 = vld [vmem:[#allocation7 + $0x110] sm:$0xff]  ;;  %v1569_v40 = vpack.c.bf16 %v822_v14, %v819_v13 }
 0x28a   :  { %1633 = vrcp.f32 %v559_v15  ;;  %v824_v15 = vld [vmem:[#allocation7 + $0xf8] sm:$0xff] }
 0x28b   :  { %1635 = vrcp.f32 %v566_v19  ;;  %v823_v19 = vld [vmem:[#allocation7 + $0xf0] sm:$0xff] }
 0x294   :  { %v1634_v22 = vpop.eup %1633 }
 0x295   :  { %v1636_v26 = vpop.eup %1635 }
 0x296   :  { %v580_v28 = vsub.f32 1.0, %v1636_v26  ;;  %v582_v36 = vmul.f32 %v1636_v26, %v2003_v10  ;;  %v1532_v10 = vpack.c.bf16 %v809_v48, %v806_v47  ;;  %v829_v26 = vld [vmem:[#allocation7 + $0x120] sm:$0xff]  ;;  %v1014_v47 = vld [vmem:[#allocation8 + $0x8] sm:$0xff] }
 0x297   :  { %v1550_v34 = vpack.c.bf16 %v832_v29, %v829_v26  ;;  %v1581_v48 = vpack.c.bf16 %v1014_v47, %v1013_v46 }
 0x29a   :  { %v551_v41 = vpop.f32.mrb[6].mxu0 }
 0x29b   :  { %v576_v20 = vadd.f32 %v1147_v18, %v551_v41  ;;  %v1290_v21 = vpop.f32.mrb[7].mxu0  ;;  %v1542_v18 = vpack.c.bf16 %v820_v12, %v817_v8  ;;  %v1544_v41 = vpack.c.bf16 %v827_v17, %v824_v15  ;;  %v635_v12 = vld [vmem:[%s2138_s9] sm:$0x7] }
 0x29c   :  { %v825_v21 = vld [vmem:[#allocation7 + $0x100] sm:$0xff]  ;;  %v640_v13 = vrot.slane %v635_v12, %v208_v60  ;;  %v644_v15 = vrot.slane %v635_v12, %v212_v63  ;;  %v1151_v60 = vld [vmem:[%s2139_s10] ss:$0 sm:$0xff]  ;;  %v648_v63 = vrot.slane %v635_v12, %v216_v16  ;;  %s1803_s10 = smov [#allocation11]  }
 0x29d   :  { %v577_v24 = vmul.f32 %v1634_v22, %v576_v20  ;;  %v826_v20 = vld [vmem:[#allocation7 + $0x108] sm:$0xff]  ;;  %v828_v22 = vld [vmem:[#allocation7 + $0x118] sm:$0xff]  ;;  %s1122_s29 = sshll.u32 %s1803_s10, 4  ;;  %s1123_s29 = int_to_ptr.vmem [resolvable:$true] %s1122_s29 }
 0x29e   :  { %v1572_v27 = vpack.c.bf16 %v828_v22, %v825_v21  ;;  %s1737_s15 = scalar_lea.vmem %s1123_s29, 64  ;;  %p1742_p5 = scmp.lt.s32.totalorder %s1123_s29, %s1123_s29 }
 0x29f   :  { %v578_v25 = vadd.f32 %v577_v24, %v363_v23  ;;  %v830_v23 = vld [vmem:[#allocation7 + $0x128] sm:$0xff]  ;;  %v833_v24 = vld [vmem:[#allocation7 + $0x140] sm:$0xff]  ;;  %p1738_p4 = scmp.ne.s32.totalorder %s1123_s29, %s1737_s15  ;;  %p1743_p6 = scmp.lt.s32.totalorder %s1737_s15, %s1737_s15 }
 0x2a1   :  { %1637 = vtanh.f32 %v578_v25  ;;  %v1546_v25 = vpack.c.bf16 %v826_v20, %v823_v19  ;;  %p1744_p7 = por %p1743_p6, %p1742_p5 }
 0x2a3   :  { %p1745_p8 = pnand %p1744_p7, %p1738_p4 }
 0x2ab   :  { %v1638_v32 = vpop.eup %1637 }
 0x2ac   :  { %v581_v35 = vmul.f32 %v1638_v32, %v580_v28  ;;  %v1548_v28 = vpack.c.bf16 %v833_v24, %v830_v23  ;;  %v836_v32 = vld [vmem:[#allocation7 + $0x158] sm:$0xff] }
 0x2ae   :  { %v583_v42 = vadd.f32 %v582_v36, %v581_v35  ;;  %v835_v35 = vld [vmem:[#allocation7 + $0x150] sm:$0xff]  ;;  %v1575_v36 = vpack.c.bf16 %v834_v31, %v831_v30 }
 0x2b0   :  { %717 = vmatmul.mubr.f32.vlgmr.msra.gmra.mrb[2].mxu1 %v583_v42  ;;  %584 = vst [vmem:[#allocation11] sm:$0x3] %v583_v42  ;;  %1324 = vmatmul.mubr.f32.vlgmr.msra.gmra.mrb[8].mxu0 %v583_v42  ;;  %v840_v42 = vld [vmem:[#allocation7 + $0x178] sm:$0xff] }
 0x2b1   :  { %1527 = vmatpush1.bf16.msra.mxu1 %v1526_v37  ;;  %1558 = vmatpush3.bf16.msra.mxu0 %v1557_v39  ;;  %v1552_v37 = vpack.c.bf16 %v839_v33, %v836_v32  ;;  %v837_v39 = vld [vmem:[#allocation7 + $0x160] sm:$0xff] }
 0x2b2   :  { %1529 = vmatprep.subr.bf16.mxu1 %v1528_v43  ;;  %1559 = vmatprep.subr.bf16.mxu0 %v1800_v1  ;;  %v1554_v43 = vpack.c.bf16 %v838_v38, %v835_v35  ;;  %v1578_v44 = vpack.c.bf16 %v840_v42, %v837_v39 }
 0x2b3   :  { %905 = vmatprep.mubr.f32.mxu1 %v1801_v2  ;;  %1358 = vmatprep.mubr.msk.f32.mxu0 %vm1802_vm0, %v1801_v2 }
 0x2b5   :  { %1531 = vmatpush1.bf16.msra.mxu1 %v1530_v49  ;;  %1561 = vmatpush3.bf16.msra.mxu0 %v1560_v51  ;;  %v1015_v49 = vld [vmem:[#allocation8 + $0x10] sm:$0xff] }
 0x2b6   :  { %1533 = vmatprep.subr.bf16.mxu1 %v1532_v10  ;;  %1562 = vmatprep.subr.bf16.mxu0 %v1800_v1  ;;  %v1584_v51 = vpack.c.bf16 %v1016_v50, %v1015_v49  ;;  %v1017_v10 = vld [vmem:[#allocation8 + $0x20] sm:$0xff] }
 0x2b7   :  { %v1587_v53 = vpack.c.bf16 %v1018_v52, %v1017_v10 }
 0x2b9   :  { %1535 = vmatpush1.bf16.msra.mxu1 %v1534_v57  ;;  %1564 = vmatpush3.bf16.msra.mxu0 %v1563_v61  ;;  %v1022_v57 = vld [vmem:[#allocation8 + $0x48] sm:$0xff]  ;;  %v1023_v61 = vld [vmem:[#allocation8 + $0x50] sm:$0xff] }
 0x2ba   :  { %1537 = vmatprep.subr.bf16.mxu1 %v1536_v0  ;;  %1565 = vmatprep.subr.bf16.mxu0 %v1800_v1  ;;  %v1593_v58 = vpack.c.bf16 %v1022_v57, %v1021_v56  ;;  %v1024_v0 = vld [vmem:[#allocation8 + $0x58] sm:$0xff] }
 0x2bb   :  { %v1596_v3 = vpack.c.bf16 %v1024_v0, %v1023_v61 }
 0x2bd   :  { %1539 = vmatpush1.bf16.msra.mxu1 %v1538_v62  ;;  %1567 = vmatpush3.bf16.msra.mxu0 %v1566_v9  ;;  %v1028_v62 = vld [vmem:[#allocation8 + $0x78] sm:$0xff] }
 0x2be   :  { %1541 = vmatprep.subr.bf16.mxu1 %v1540_v11  ;;  %1568 = vmatprep.subr.bf16.mxu0 %v1800_v1  ;;  %v1602_v8 = vpack.c.bf16 %v1028_v62, %v1027_v7 }
 0x2c1   :  { %1543 = vmatpush1.bf16.msra.mxu1 %v1542_v18  ;;  %1570 = vmatpush3.bf16.msra.mxu0 %v1569_v40 }
 0x2c2   :  { %1545 = vmatprep.subr.bf16.mxu1 %v1544_v41  ;;  %1571 = vmatprep.subr.bf16.mxu0 %v1800_v1 }
 0x2c5   :  { %1547 = vmatpush1.bf16.msra.mxu1 %v1546_v25  ;;  %1573 = vmatpush3.bf16.msra.mxu0 %v1572_v27 }
 0x2c6   :  { %1549 = vmatprep.subr.bf16.mxu1 %v1548_v28  ;;  %1574 = vmatprep.subr.bf16.mxu0 %v1800_v1 }
 0x2c9   :  { %1551 = vmatpush1.bf16.msra.mxu1 %v1550_v34  ;;  %1576 = vmatpush3.bf16.msra.mxu0 %v1575_v36 }
 0x2ca   :  { %1553 = vmatprep.subr.bf16.mxu1 %v1552_v37  ;;  %1577 = vmatprep.subr.bf16.mxu0 %v1800_v1 }
 0x2cd   :  { %1555 = vmatpush1.bf16.msra.mxu1 %v1554_v43  ;;  %1579 = vmatpush3.bf16.msra.mxu0 %v1578_v44 }
 0x2ce   :  { %1580 = vmatprep.subr.bf16.mxu1 %v1800_v1 }
 0x2d0   :  { %906 = vmatmul.mubr.f32.vlgmr.msra.gmra.mrb[2].mxu1 %v2075_v45  ;;  %1359 = vmatmul.mubr.f32.vlgmr.msra.gmra.mrb[10].mxu0 %v2075_v45 }
 0x2d1   :  { %1393 = vmatprep.mubr.msk.f32.mxu1 %vm1802_vm0, %v1801_v2  ;;  %1582 = vmatpush3.bf16.msra.mxu1 %v1581_v48  ;;  %v1020_v2 = vld [vmem:[#allocation8 + $0x38] sm:$0xff] }
 0x2d2   :  { %1583 = vmatprep.subr.bf16.mxu1 %v1800_v1  ;;  %v1590_v55 = vpack.c.bf16 %v1020_v2, %v1019_v54 }
 0x2d5   :  { %1585 = vmatpush3.bf16.msra.mxu1 %v1584_v51 }
 0x2d6   :  { %1586 = vmatprep.subr.bf16.mxu1 %v1800_v1 }
 0x2d9   :  { %1588 = vmatpush3.bf16.msra.mxu1 %v1587_v53 }
 0x2da   :  { %1589 = vmatprep.subr.bf16.mxu1 %v1800_v1 }
 0x2dd   :  { %1591 = vmatpush3.bf16.msra.mxu1 %v1590_v55 }
 0x2de   :  { %1592 = vmatprep.subr.bf16.mxu1 %v1800_v1 }
 0x2e1   :  { %1594 = vmatpush3.bf16.msra.mxu1 %v1593_v58 }
 0x2e2   :  { %1595 = vmatprep.subr.bf16.mxu1 %v1800_v1 }
 0x2e5   :  { %1597 = vmatpush3.bf16.msra.mxu1 %v1596_v3 }
 0x2e6   :  { %1598 = vmatprep.subr.bf16.mxu1 %v1800_v1 }
 0x2e9   :  { %1600 = vmatpush3.bf16.msra.mxu1 %v1599_v6 }
 0x2ea   :  { %1601 = vmatprep.subr.bf16.mxu1 %v1800_v1 }
 0x2ed   :  { %1603 = vmatpush3.bf16.msra.mxu1 %v1602_v8 }
 0x383   :  { %v789_v9 = vpop.f32.mrb[8].mxu0 }
 0x384   :  { %v1325_v11 = vpop.f32.mrb[9].mxu0  ;;  %v790_v27 = vadd.f32 %v789_v9, %v648_v63 }
 0x3a3   :  { %v907_v14 = vpop.f32.mrb[2].mxu1  ;;  %v978_v17 = vpop.f32.mrb[10].mxu0 }
 0x3a4   :  { %v1608_v18 = vadd.f32 %v907_v14, %v640_v13  ;;  %v909_v19 = vpop.f32.mrb[3].mxu1  ;;  %v1360_v40 = vpop.f32.mrb[11].mxu0  ;;  %v1003_v25 = vadd.f32 %v1151_v60, %v978_v17 }
 0x3a5   :  { %v1609_v1 = vadd.f32 %v909_v19, %v644_v15 }
 0x3a6   :  { %v1149_v41 = vmul.f32 -1.442695, %v1608_v18 }
 0x3a7   :  { %v1150_v20 = vmul.f32 -1.442695, %v1609_v1 }
 0x3a8   :  { %1639 = vpow2.f32 %v1149_v41 }
 0x3a9   :  { %1641 = vpow2.f32 %v1150_v20 }
 0x3b2   :  { %v1640_v21 = vpop.eup %1639 }
 0x3b3   :  { %v986_v22 = vadd.f32 1.0, %v1640_v21  ;;  %v1642_v23 = vpop.eup %1641 }
 0x3b4   :  { %v993_v24 = vadd.f32 1.0, %v1642_v23 }
 0x3b5   :  { %1643 = vrcp.f32 %v986_v22 }
 0x3b6   :  { %1645 = vrcp.f32 %v993_v24 }
 0x3bf   :  { %v1644_v26 = vpop.eup %1643 }
 0x3c0   :  { %v1004_v28 = vmul.f32 %v1644_v26, %v1003_v25  ;;  %v1646_v30 = vpop.eup %1645 }
 0x3c1   :  { %v1007_v31 = vsub.f32 1.0, %v1646_v30  ;;  %v1009_v34 = vmul.f32 %v1646_v30, %v2075_v45 }
 0x3c2   :  { %v1005_v29 = vadd.f32 %v1004_v28, %v790_v27 }
 0x3c4   :  { %1647 = vtanh.f32 %v1005_v29 }
 0x3ce   :  { %v1648_v32 = vpop.eup %1647 }
 0x3cf   :  { %v1008_v33 = vmul.f32 %v1648_v32, %v1007_v31 }
 0x3d1   :  { %v1010_v35 = vadd.f32 %v1009_v34, %v1008_v33 }
 0x3d3   :  { %1394 = vmatmul.mubr.f32.vlgmr.msra.gmra.mrb[4].mxu1 %v1010_v35  ;;  %1012 = vst [vmem:[#allocation11 + $0x2] sm:$0x3] %v1010_v35 }
 0x3d4   :  { %1748 = shalt.err (!%p1745_p8)
}
 0x3d5   :  { %s1749_s8 = scalar_lea.hbm %s2143_s14, 64 }
 0x3d6   :  { %p1750_p9 = scmp.ne.s32.totalorder %s2143_s14, %s1749_s8  ;;  %p1753_p10 = scmp.lt.u32.totalorder %s1749_s8, %s2143_s14 }
 0x3d8   :  { %p1755_p11 = pnand %p1753_p10, %p1750_p9 }
 0x3da   :  { %1758 = shalt.err (!%p1755_p11)
}
 0x3db   :  { %s1804_s19 = smov 32   ;;  %s1805_s20 = smov 2   ;;  %v1152_v59 = vld [vmem:[%s2141_s12] ss:$0 sm:$0xff] }
 0x3dc   :  { %1128 = dma.vmem_to_hbm [thread:$0]  %s1123_s29, 64, %s2143_s14, [#allocation12], %s1804_s19, %s1804_s19, %s1805_s20  }
 0x3dd   :  { %s1806_s16 = smov [#allocation10]  }
 0x3de   :  { %s1113_s22 = sshll.u32 %s1806_s16, 4  ;;  %s1114_s22 = int_to_ptr.vmem [resolvable:$true] %s1113_s22 }
 0x3df   :  { %s1759_s3 = scalar_lea.vmem %s1114_s22, 32  ;;  %p1764_p13 = scmp.lt.s32.totalorder %s1114_s22, %s1114_s22 }
 0x3e0   :  { %p1760_p12 = scmp.ne.s32.totalorder %s1114_s22, %s1759_s3  ;;  %p1765_p0 = scmp.lt.s32.totalorder %s1759_s3, %s1759_s3 }
 0x3e2   :  { %p1766_p1 = por %p1765_p0, %p1764_p13 }
 0x3e4   :  { %p1767_p2 = pnand %p1766_p1, %p1760_p12 }
 0x4a6   :  { %v1102_v16 = vpop.f32.mrb[4].mxu1 }
 0x4a7   :  { %v1103_v36 = vadd.f32 %v1152_v59, %v1102_v16  ;;  %v1395_v37 = vpop.f32.mrb[5].mxu1 }
 0x4a9   :  { %1106 = vst [vmem:[#allocation10] sm:$0x3] %v1103_v36 }
 0x4aa   :  { %1770 = shalt.err (!%p1767_p2)
}
 0x4ab   :  { %s1771_s5 = scalar_lea.hbm %s2142_s13, 32 }
 0x4ac   :  { %p1772_p3 = scmp.ne.s32.totalorder %s2142_s13, %s1771_s5  ;;  %p1775_p4 = scmp.lt.u32.totalorder %s1771_s5, %s2142_s13 }
 0x4ae   :  { %p1777_p5 = pnand %p1775_p4, %p1772_p3 }
 0x4b0   :  { %1780 = shalt.err (!%p1777_p5)
}
 0x4b1   :  { %1116 = dma.vmem_to_hbm [thread:$0]  %s1114_s22, 32, %s2142_s13, [#allocation4]  }
 0x4b2   :  { %1787 = dma.done.wait [#allocation4], 32  }
 0x4b3   :  { %1788 = vsyncadd [#allocation4], 4294967264 }
 0x4b4   :  { %1789 = dma.done.wait [#allocation12], 64  }
 0x4b5   :  { %1790 = vsyncadd [#allocation12], 4294967232 }
 0x4b6   :  { %1135 = vsyncpa [#allocation3], 1 }
 0x4b7   :  { %1136 = vsyncpa [#allocation6], 1 }
 0x4b8   :  { %1137 = vsyncpa [#allocation9], 1 }
 0x4b9   :  { %1138 = vsyncpa [#allocation4], 1 }
 0x4ba   :  { %1139 = vsyncpa [#allocation12], 1 }

</bundles_post_ra>
